<compile_context>
chip_gen: v7x
topology: tpu7x:2x2x1
jax: 0.10.0
libtpu: 0.0.40
codegen_flags: <defaults>
</compile_context>

<pallas_src>
import functools

import jax
import jax.numpy as jnp
from jax.experimental import pallas as pl
from jax.experimental.pallas import tpu as pltpu


def _round_up(x, n):
    return (x + n - 1) // n * n


def _cdiv(a, b):
    return -(-a // b)


def _nc2_kernel(means_ref, out_ref, gram_acc, *, mm_dtype):
    """Grid axis 0 streams tiles of the feature dimension D (reduction axis)."""
    k = pl.program_id(0)
    c = means_ref.shape[0]

    @pl.when(k == 0)
    def _init():
        gram_acc[...] = jnp.zeros_like(gram_acc)

    m = means_ref[...].astype(jnp.float32)                        # (C, TD)
    # Global mean over classes (all rows are real: no row padding anywhere).
    col_mean = jnp.sum(m, axis=0, keepdims=True) * (1.0 / c)
    centered = (m - col_mean).astype(mm_dtype)                    # (C, TD)

    # Un-normalized gram A @ A.T on the MXU (contract the feature axis of both
    # operands -> no in-kernel transpose of the (C, TD) tile).
    gram_acc[...] += jax.lax.dot_general(
        centered, centered,
        dimension_numbers=(((1,), (1,)), ((), ())),
        preferred_element_type=jnp.float32)

    @pl.when(k == pl.num_programs(0) - 1)
    def _finalize():
        gram = gram_acc[...]                                      # (C, C)
        rows = jax.lax.broadcasted_iota(jnp.int32, (c, 1), 0)
        cols = jax.lax.broadcasted_iota(jnp.int32, (1, c), 1)
        eye = rows == cols                                        # broadcast -> (C, C)

        # Row norms^2 live on the gram diagonal; reduce it along both axes so no
        # (C, 1) transpose is needed in-kernel.  Keep F.normalize's eps guard.
        diag = jnp.where(eye, gram, 0.0)
        inv_col = 1.0 / jnp.maximum(
            jnp.sqrt(jnp.sum(diag, axis=1, keepdims=True)), 1e-12)   # (C, 1)
        inv_row = 1.0 / jnp.maximum(
            jnp.sqrt(jnp.sum(diag, axis=0, keepdims=True)), 1e-12)   # (1, C)

        cosine = gram * inv_col * inv_row                         # (C, C)
        # cosine_ = cosine - 2*diag(diag(cosine))  ==  flip the diagonal's sign.
        cosine_off = jnp.where(eye, -cosine, cosine)
        max_cos = jnp.clip(jnp.max(cosine_off), -0.99999, 0.99999)

        # final = cosine_ + (1 - 1/(C-1)) * diag(diag(original cosine))
        coef = 1.0 - 1.0 / (c - 1)
        final = jnp.where(eye, (coef - 1.0) * cosine, cosine)
        loss = jnp.sqrt(jnp.sum(final * final))                   # Frobenius norm

        # Single lane-dense (1, 128) output: lane 0 = loss, lane 1 = max_cosine.
        lane = jax.lax.broadcasted_iota(jnp.int32, (1, 128), 1)
        out_ref[...] = jnp.where(lane == 0, loss,
                                 jnp.where(lane == 1, max_cos, 0.0))


def _choose_feature_tile(D, td_cap):
    """Return (tile, padded_D, n_steps). Prefers zero padding / zero copies."""
    if D <= td_cap:
        return D, D, 1                          # one full-width block, no pad
    if D % 128 == 0:
        # Largest 128-multiple divisor of D under the cap -> no padding at all.
        n128 = D // 128
        for t in range(td_cap // 128, 0, -1):
            if n128 % t == 0 and t * 128 >= max(512, td_cap // 4):
                return t * 128, D, D // (t * 128)
    # General case: near-equal tiles, pad D up to n_steps * td (< 128 cols/tile).
    n_steps = _cdiv(D, td_cap)
    td = _round_up(_cdiv(D, n_steps), 128)
    return td, n_steps * td, n_steps


def nc2loss_v2(means):
    """means: (C, D). Returns (loss, max_cosine) like NC2Loss_v2.forward."""
    C, D = means.shape
    if C < 2:
        raise ValueError("NC2Loss_v2 needs C >= 2 (PyTorch divides by C - 1).")

    itemsize = jnp.dtype(means.dtype).itemsize
    c8 = _round_up(C, 8)          # physical sublane rows of any (C, *) tile
    c128 = _round_up(C, 128)      # physical lane width of the (C, C) gram
    gram_bytes = c8 * c128 * 4
    finalize_bytes = 6 * gram_bytes                   # live (C, C) temps, upper bound

    # Feature tile from a VMEM budget: double-buffered (C, TD) input slabs plus
    # the gram scratch and finalize temporaries must fit well under 64 MiB (v7x).
    input_budget = max(2 << 20, (40 << 20) - gram_bytes - finalize_bytes)
    td_cap = max(128, (input_budget // (2 * c8 * itemsize)) // 128 * 128)
    td, dp, n_steps = _choose_feature_tile(D, td_cap)

    # Native dtype; pad feature columns with zeros only if strictly needed
    # (zero columns contribute exactly 0 to the mean and the gram).
    means_in = means if dp == D else jnp.pad(means, ((0, 0), (0, dp - D)))

    # bf16 inputs keep a bf16 MXU path (f32 accumulation); f32 stays f32.
    mm_dtype = jnp.bfloat16 if means.dtype == jnp.bfloat16 else jnp.float32

    vmem_need = 2 * c8 * td * itemsize + gram_bytes + finalize_bytes + (1 << 20)
    vmem_limit = int(min(64 << 20, max(vmem_need, 32 << 20)))

    kernel = functools.partial(_nc2_kernel, mm_dtype=mm_dtype)

    out = pl.pallas_call(
        kernel,
        out_shape=jax.ShapeDtypeStruct((1, 128), jnp.float32),
        grid_spec=pltpu.PrefetchScalarGridSpec(
            num_scalar_prefetch=0,
            grid=(n_steps,),
            in_specs=[pl.BlockSpec((C, td), lambda k: (0, k))],
            out_specs=pl.BlockSpec((1, 128), lambda k: (0, 0)),
            scratch_shapes=[pltpu.VMEM((C, C), jnp.float32)],
        ),
        compiler_params=pltpu.CompilerParams(
            dimension_semantics=("arbitrary",),       # reduction over D tiles
            vmem_limit_bytes=vmem_limit),
        cost_estimate=pl.CostEstimate(
            flops=2 * C * C * dp + 8 * C * C,
            transcendentals=2 * C + 1,
            bytes_accessed=C * dp * itemsize + 512),
    )(means_in)

    return out[0, 0], out[0, 1]


if __name__ == "__main__":
    # Small deterministic setup consistent with the module: means is the
    # (num_classes, feat_dim) class-mean parameter.
    num_classes = 10
    feat_dim = 32

    key = jax.random.PRNGKey(0)
    means = jax.random.normal(key, (num_classes, feat_dim), dtype=jnp.float32)

    loss, max_cos = nc2loss_v2(means)
    jax.block_until_ready((loss, max_cos))

    # Pure-JAX reference (same math as the PyTorch module).
    C = num_classes
    g_mean = jnp.mean(means, axis=0)
    centered = means - g_mean
    norms = jnp.sqrt(jnp.sum(centered * centered, axis=1, keepdims=True))
    means_n = centered / jnp.maximum(norms, 1e-12)        # F.normalize, eps=1e-12
    cosine = jnp.einsum("id,jd->ij", means_n, means_n,
                        precision=jax.lax.Precision.HIGHEST)
    diag = jnp.diag(jnp.diag(cosine))
    cosine_off = cosine - 2.0 * diag
    ref_max = jnp.clip(jnp.max(cosine_off), -0.99999, 0.99999)
    ref_final = cosine_off + (1.0 - 1.0 / (C - 1)) * diag
    ref_loss = jnp.sqrt(jnp.sum(ref_final * ref_final))

    assert jnp.allclose(loss, ref_loss, rtol=1e-4, atol=1e-4), (loss, ref_loss)
    assert jnp.allclose(max_cos, ref_max, rtol=1e-4, atol=1e-4), (max_cos, ref_max)

    print("KERNEL_OK")
</pallas_src>

<mosaic_0001>
module attributes {stable_mosaic.version = 11 : i64} {
  func.func @_nc2_kernel(%arg0: i32, %arg1: memref<10x32xf32, #tpu.memory_space<vmem>>, %arg2: memref<1x128xf32, #tpu.memory_space<vmem>>, %arg3: memref<10x10xf32, #tpu.memory_space<vmem>>) attributes {dimension_semantics = [#tpu.dimension_semantics<arbitrary>], iteration_bounds = array<i64: 1>, scalar_prefetch = 0 : i64, scratch_operands = 1 : i64, tpu.core_type = #tpu.core_type<tc>, window_params = [{transform_indices = @transform_0, window_bounds = array<i64: 10, 32>}, {pipeline_mode = #tpu.pipeline_mode<synchronous>, transform_indices = @transform_1, window_bounds = array<i64: 1, 128>}]} {
    %c0_i32 = arith.constant 0 : i32
    %0 = arith.cmpi eq, %arg0, %c0_i32 : i32
    %1 = arith.extui %0 : i1 to i32
    %c0_i32_0 = arith.constant 0 : i32
    %2 = arith.cmpi ne, %1, %c0_i32_0 : i32
    scf.if %2 {
      %cst_10 = arith.constant 0.000000e+00 : f32
      %17 = vector.broadcast %cst_10 : f32 to vector<10x10xf32>
      %c0_11 = arith.constant 0 : index
      %c0_12 = arith.constant 0 : index
      %18 = vector.load %arg3[%c0_11, %c0_12] : memref<10x10xf32, #tpu.memory_space<vmem>>, vector<10x10xf32>
      tpu.vector_store %arg3[%c0_11, %c0_12], %17 {strides = array<i32>} : memref<10x10xf32, #tpu.memory_space<vmem>>, vector<10x10xf32>,
    } else {
    }
    %c0 = arith.constant 0 : index
    %c0_1 = arith.constant 0 : index
    %3 = vector.load %arg1[%c0, %c0_1] : memref<10x32xf32, #tpu.memory_space<vmem>>, vector<10x32xf32>
    %cst = arith.constant dense<0.000000e+00> : vector<32xf32>
    %4 = vector.multi_reduction <add>, %3, %cst [0] : vector<10x32xf32> to vector<32xf32>
    %5 = vector.shape_cast %4 : vector<32xf32> to vector<1x32xf32>
    %cst_2 = arith.constant 1.000000e-01 : f32
    %6 = vector.broadcast %cst_2 : f32 to vector<1x32xf32>
    %7 = arith.mulf %5, %6 : vector<1x32xf32>
    %8 = vector.broadcast %7 : vector<1x32xf32> to vector<10x32xf32>
    %9 = arith.subf %3, %8 : vector<10x32xf32>
    %c0_3 = arith.constant 0 : index
    %c0_4 = arith.constant 0 : index
    %10 = vector.load %arg3[%c0_3, %c0_4] : memref<10x10xf32, #tpu.memory_space<vmem>>, vector<10x10xf32>
    %cst_5 = arith.constant dense<0.000000e+00> : vector<10x10xf32>
    %11 = tpu.matmul %9, %9, %cst_5 {dimension_numbers = #tpu.dot_dimension_numbers<[1], [1], [0], [0], [0, 0, 1, 0], [], []>} : vector<10x32xf32>, vector<10x32xf32>, vector<10x10xf32> -> vector<10x10xf32>
    %12 = arith.addf %10, %11 : vector<10x10xf32>
    %c0_6 = arith.constant 0 : index
    %c0_7 = arith.constant 0 : index
    %13 = vector.load %arg3[%c0_6, %c0_7] : memref<10x10xf32, #tpu.memory_space<vmem>>, vector<10x10xf32>
    tpu.vector_store %arg3[%c0_6, %c0_7], %12 {strides = array<i32>} : memref<10x10xf32, #tpu.memory_space<vmem>>, vector<10x10xf32>,
    %c0_i32_8 = arith.constant 0 : i32
    %14 = arith.cmpi eq, %arg0, %c0_i32_8 : i32
    %15 = arith.extui %14 : i1 to i32
    %c0_i32_9 = arith.constant 0 : i32
    %16 = arith.cmpi ne, %15, %c0_i32_9 : i32
    scf.if %16 {
      %c0_10 = arith.constant 0 : index
      %c0_11 = arith.constant 0 : index
      %17 = vector.load %arg3[%c0_10, %c0_11] : memref<10x10xf32, #tpu.memory_space<vmem>>, vector<10x10xf32>
      %18 = tpu.iota {dimensions = array<i32: 0>} : vector<10x1xi32>
      %19 = tpu.iota {dimensions = array<i32: 1>} : vector<1x10xi32>
      %20 = vector.broadcast %18 : vector<10x1xi32> to vector<10x10xi32>
      %21 = vector.broadcast %19 : vector<1x10xi32> to vector<10x10xi32>
      %22 = arith.cmpi eq, %20, %21 : vector<10x10xi32>
      %cst_12 = arith.constant 0.000000e+00 : f32
      %23 = vector.broadcast %cst_12 : f32 to vector<10x10xf32>
      %24 = arith.select %22, %17, %23 : vector<10x10xi1>, vector<10x10xf32>
      %cst_13 = arith.constant dense<0.000000e+00> : vector<10xf32>
      %25 = vector.multi_reduction <add>, %24, %cst_13 [1] : vector<10x10xf32> to vector<10xf32>
      %26 = vector.shape_cast %25 : vector<10xf32> to vector<10x1xf32>
      %27 = math.sqrt %26 : vector<10x1xf32>
      %cst_14 = arith.constant 9.99999996E-13 : f32
      %28 = vector.broadcast %cst_14 : f32 to vector<10x1xf32>
      %29 = arith.maximumf %27, %28 : vector<10x1xf32>
      %cst_15 = arith.constant 1.000000e+00 : f32
      %30 = vector.broadcast %cst_15 : f32 to vector<10x1xf32>
      %31 = arith.divf %30, %29 : vector<10x1xf32>
      %cst_16 = arith.constant dense<0.000000e+00> : vector<10xf32>
      %32 = vector.multi_reduction <add>, %24, %cst_16 [0] : vector<10x10xf32> to vector<10xf32>
      %33 = vector.shape_cast %32 : vector<10xf32> to vector<1x10xf32>
      %34 = math.sqrt %33 : vector<1x10xf32>
      %cst_17 = arith.constant 9.99999996E-13 : f32
      %35 = vector.broadcast %cst_17 : f32 to vector<1x10xf32>
      %36 = arith.maximumf %34, %35 : vector<1x10xf32>
      %cst_18 = arith.constant 1.000000e+00 : f32
      %37 = vector.broadcast %cst_18 : f32 to vector<1x10xf32>
      %38 = arith.divf %37, %36 : vector<1x10xf32>
      %39 = vector.broadcast %31 : vector<10x1xf32> to vector<10x10xf32>
      %40 = arith.mulf %17, %39 : vector<10x10xf32>
      %41 = vector.broadcast %38 : vector<1x10xf32> to vector<10x10xf32>
      %42 = arith.mulf %40, %41 : vector<10x10xf32>
      %cst_19 = arith.constant 0.000000e+00 : f32
      %43 = vector.broadcast %cst_19 : f32 to vector<10x10xf32>
      %44 = arith.subf %43, %42 : vector<10x10xf32>
      %45 = arith.select %22, %44, %42 : vector<10x10xi1>, vector<10x10xf32>
      %46 = vector.shape_cast %45 : vector<10x10xf32> to vector<1x10x10xf32>
      %cst_20 = arith.constant dense<0xFF800000> : vector<1xf32>
      %47 = vector.multi_reduction <maximumf>, %46, %cst_20 [1, 2] : vector<1x10x10xf32> to vector<1xf32>
      %48 = vector.shape_cast %47 : vector<1xf32> to vector<1x1x1xf32>
      %49 = vector.extract %48[0, 0, 0] : f32 from vector<1x1x1xf32>
      %cst_21 = arith.constant -0.999989986 : f32
      %cst_22 = arith.constant 0.999989986 : f32
      %50 = arith.maximumf %cst_21, %49 : f32
      %51 = arith.minimumf %cst_22, %50 : f32
      %cst_23 = arith.constant -0.111111112 : f32
      %52 = vector.broadcast %cst_23 : f32 to vector<10x10xf32>
      %53 = arith.mulf %52, %42 : vector<10x10xf32>
      %54 = arith.select %22, %53, %42 : vector<10x10xi1>, vector<10x10xf32>
      %55 = arith.mulf %54, %54 : vector<10x10xf32>
      %56 = vector.shape_cast %55 : vector<10x10xf32> to vector<1x10x10xf32>
      %cst_24 = arith.constant dense<0.000000e+00> : vector<1xf32>
      %57 = vector.multi_reduction <add>, %56, %cst_24 [1, 2] : vector<1x10x10xf32> to vector<1xf32>
      %58 = vector.shape_cast %57 : vector<1xf32> to vector<1x1x1xf32>
      %59 = vector.extract %58[0, 0, 0] : f32 from vector<1x1x1xf32>
      %60 = math.sqrt %59 : f32
      %61 = tpu.iota {dimensions = array<i32: 1>} : vector<1x128xi32>
      %c0_i32_25 = arith.constant 0 : i32
      %62 = vector.broadcast %c0_i32_25 : i32 to vector<1x128xi32>
      %63 = arith.cmpi eq, %61, %62 : vector<1x128xi32>
      %c1_i32 = arith.constant 1 : i32
      %64 = vector.broadcast %c1_i32 : i32 to vector<1x128xi32>
      %65 = arith.cmpi eq, %61, %64 : vector<1x128xi32>
      %cst_26 = arith.constant 0.000000e+00 : f32
      %66 = vector.broadcast %51 : f32 to vector<1x128xf32>
      %67 = vector.broadcast %cst_26 : f32 to vector<1x128xf32>
      %68 = arith.select %65, %66, %67 : vector<1x128xi1>, vector<1x128xf32>
      %69 = vector.broadcast %60 : f32 to vector<1x128xf32>
      %70 = arith.select %63, %69, %68 : vector<1x128xi1>, vector<1x128xf32>
      %c0_27 = arith.constant 0 : index
      %c0_28 = arith.constant 0 : index
      %71 = vector.load %arg2[%c0_27, %c0_28] : memref<1x128xf32, #tpu.memory_space<vmem>>, vector<1x128xf32>
      tpu.vector_store %arg2[%c0_27, %c0_28], %70 {strides = array<i32>} : memref<1x128xf32, #tpu.memory_space<vmem>>, vector<1x128xf32>,
    } else {
    }
    return
  }
  func.func @transform_0(%arg0: i32) -> (i32, i32) {
    %c0_i32 = arith.constant 0 : i32
    %c0_i32_0 = arith.constant 0 : i32
    return %c0_i32, %arg0 : i32, i32
  }
  func.func @transform_1(%arg0: i32) -> (i32, i32) {
    %c0_i32 = arith.constant 0 : i32
    %c0_i32_0 = arith.constant 0 : i32
    %c0_i32_1 = arith.constant 0 : i32
    return %c0_i32, %c0_i32_0 : i32, i32
  }
}

</mosaic_0001>

<bundles_post_ra>
// kernel: tpu_custom_call.1
= control target key start
LH: loop header
LB: loop body
LE: loop exit
PB: predicated region body
PF: predicated region fallthrough
CT: control target
= control target key end

     0   :  { %6 = vsyncpa [#allocation4], 0  ;;  %s447_s0 = inlined_call_operand.hbm [shape: f32[10,32], index: 0, kind: input, shape index: {}]   ;;  %s448_s1 = inlined_call_operand.hbm [shape: f32[1,128], index: 1, kind: output, shape index: {}]  }
   0x1   :  { %7 = vsyncpa [#allocation5], 0  ;;  %s360_s6 = smov [#allocation3]   ;;  %s312_s10 = scalar_lea.hbm %s447_s0, 256 }
   0x2   :  { %s13_s7 = sshll.u32 %s360_s6, 4  ;;  %p313_p0 = scmp.ne.s32.totalorder %s447_s0, %s312_s10  ;;  %s14_s7 = int_to_ptr.vmem [resolvable:$true] %s13_s7 }
   0x3   :  { %p316_p1 = scmp.lt.u32.totalorder %s312_s10, %s447_s0 }
   0x5   :  { %p318_p2 = pnand %p316_p1, %p313_p0 }
   0x7   :  { %321 = shalt.err (!%p318_p2)
}
   0x8   :  { %s322_s15 = scalar_lea.vmem %s14_s7, 256  ;;  %p327_p4 = scmp.lt.s32.totalorder %s14_s7, %s14_s7 }
   0x9   :  { %p323_p3 = scmp.ne.s32.totalorder %s14_s7, %s322_s15  ;;  %p328_p5 = scmp.lt.s32.totalorder %s322_s15, %s322_s15 }
   0xb   :  { %p329_p6 = por %p328_p5, %p327_p4 }
   0xd   :  { %p330_p7 = pnand %p329_p6, %p323_p3 }
   0xf   :  { %333 = shalt.err (!%p330_p7)
}
  0x10   :  { %s361_s16 = smov 128   ;;  %s362_s17 = smov 8  }
  0x11   :  { %19 = dma.hbm_to_vmem [thread:$0]  %s447_s0, 256, %s14_s7, [#allocation4], %s361_s16, %s361_s16, %s362_s17  }
  0x12   :  { %356 = dma.done.wait [#allocation4], 256  }
  0x13   :  { %357 = vsyncadd [#allocation4], 4294967040  ;;  %vm29_vm0 = vcmask 74752   ;;  %v363_v0 = vmov 0.0   ;;  %vm33_vm1 = vcmask 261120   ;;  %vm35_vm2 = vcmask 254976  }
  0x14   :  { %30 = vst.msk [vmem:[#allocation2 + $0x8] sm:$0x3] %vm29_vm0, %v363_v0  ;;  %v31_v1 = vld [vmem:[#allocation3] sm:$0xff]  ;;  %v32_v2 = vld [vmem:[#allocation3 + $0x8] sm:$0x3]  ;;  %vm280_vm3 = vmpackc.low %vm33_vm1, %vm33_vm1  ;;  %vm27_vm4 = vcmask 80896   ;;  %v141_v16 = vlaneseq }
  0x15   :  { %v34_v3 = vsel %vm33_vm1, %v31_v1, 0.0  ;;  %v36_v4 = vsel %vm35_vm2, %v32_v2, 0.0  ;;  %28 = vst.msk [vmem:[#allocation2] sm:$0xff] %vm27_vm4, %v363_v0  ;;  %s364_s21 = smov -0.99999   ;;  %s366_s25 = smov [#allocation6]  }
  0x16   :  { %v37_v5 = vadd.f32 %v36_v4, %v34_v3  ;;  %v396_v20 = vshrl.u32 %v141_v16, 7  ;;  %v400_v24 = vand.u32 127, %v141_v16  ;;  %s365_s23 = smov 0.99999   ;;  %s255_s26 = sshll.u32 %s366_s25, 4  ;;  %s256_s26 = int_to_ptr.vmem [resolvable:$true] %s255_s26 }
  0x17   :  { %s334_s28 = scalar_lea.vmem %s256_s26, 16  ;;  %s338_s29 = scalar_lea.vmem %s256_s26, 32 }
  0x18   :  { %v38_v6 = vrot.slane %v37_v5, 4  ;;  %v403_v25 = vadd.s32 8, %v396_v20  ;;  %vm146_vm6 = vcmp.eq.s32.totalorder %v396_v20, %v400_v24  ;;  %vm243_vm15 = vcmp.eq.s32.totalorder %v400_v24, 1  ;;  %p335_p8 = scmp.ne.s32.totalorder %s256_s26, %s334_s28  ;;  %p339_p9 = scmp.lt.s32.totalorder %s256_s26, %s256_s26 }
  0x19   :  { %p340_p10 = scmp.lt.s32.totalorder %s338_s29, %s334_s28 }
  0x1a   :  { %v39_v7 = vadd.f32 %v38_v6, %v37_v5  ;;  %vm147_vm5 = vcmp.eq.s32.totalorder %v403_v25, %v400_v24 }
  0x1b   :  { %v48_v17 = vld [vmem:[#allocation2 + $0x8] sm:$0x3]  ;;  %p341_p11 = por %p340_p10, %p339_p9 }
  0x1c   :  { %v40_v8 = vrot.slane %v39_v7, 2  ;;  %v47_v18 = vld [vmem:[#allocation2] sm:$0xff] }
  0x1d   :  { %p342_p12 = pnand %p341_p11, %p335_p8 }
  0x1e   :  { %v41_v9 = vadd.f32 %v40_v8, %v39_v7 }
  0x20   :  { %v42_v10 = vrot.slane %v41_v9, 1 }
  0x22   :  { %v43_v11 = vadd.f32 %v42_v10, %v41_v9 }
  0x24   :  { %v44_v12 = vmul.f32 0.1, %v43_v11 }
  0x26   :  { %v45_v13 = vsub.f32 %v31_v1, %v44_v12  ;;  %v46_v14 = vsub.f32 %v32_v2, %v44_v12 }
  0x28   :  { %v279_v15 = vpack.c.bf16 %v46_v14, %v45_v13  ;;  %276 = vmatprep.mubr.msk.f32.mxu0 %vm33_vm1, %v45_v13 }
  0x2a   :  { %281 = vmatprep.subr.msk.bf16.mxu0 %vm280_vm3, %v279_v15 }
  0x2b   :  { %284 = vmatpush3.bf16.xpose.msk.msra.mxu0 %vm280_vm3, %v279_v15 }
  0x32   :  { %277 = vmatmul.mubr.msk.f32.vlgmr.msra.gmra.mrb[0].mxu0 %vm33_vm1, %v46_v14 }
 0x105   :  { %v278_v19 = vpop.f32.mrb[0].mxu0 }
 0x106   :  { %v131_v21 = vadd.f32 %v278_v19, %v48_v17  ;;  %v121_v22 = vpop.f32.mrb[1].mxu0 }
 0x107   :  { %v130_v23 = vadd.f32 %v121_v22, %v47_v18 }
 0x108   :  { %135 = vst.msk [vmem:[#allocation2 + $0x8] sm:$0x3] %vm29_vm0, %v131_v21 }
 0x109   :  { %133 = vst.msk [vmem:[#allocation2] sm:$0xff] %vm27_vm4, %v130_v23 }
 0x10f   :  { %v140_v26 = vld [vmem:[#allocation2 + $0x8] sm:$0x3] }
 0x110   :  { %v139_v27 = vld [vmem:[#allocation2] sm:$0xff]  ;;  %v149_v28 = vsel %vm147_vm5, %v140_v26, 0.0 }
 0x111   :  { %v148_v29 = vsel %vm146_vm6, %v139_v27, 0.0  ;;  %v153_v30 = vsel %vm29_vm0, %v149_v28, 0.0 }
 0x112   :  { %v150_v31 = vsel %vm27_vm4, %v148_v29, 0.0 }
 0x113   :  { %151 = vadd.xlane.f32.xlu0 %v150_v31  ;;  %v176_v32 = vadd.f32 %v153_v30, %v150_v31 }
 0x115   :  { %v177_v33 = vrot.slane %v176_v32, 4 }
 0x117   :  { %154 = vadd.xlane.f32.xlu0 %v153_v30  ;;  %v178_v34 = vadd.f32 %v177_v33, %v176_v32 }
 0x119   :  { %v179_v35 = vrot.slane %v178_v34, 2 }
 0x11b   :  { %v180_v36 = vadd.f32 %v179_v35, %v178_v34 }
 0x11d   :  { %v181_v37 = vrot.slane %v180_v36, 1 }
 0x11f   :  { %v182_v38 = vadd.f32 %v181_v37, %v180_v36 }
 0x121   :  { %298 = vrsqrt.f32 %v182_v38  ;;  %vm185_vm7 = vcmp.eq.f32.partialorder %v182_v38, inf  ;;  %v188_v45 = vand.u32 2147483648, %v182_v38  ;;  %vm187_vm8 = vcmp.eq.f32.partialorder %v182_v38, 0.0 }
 0x12b   :  { %v299_v40 = vpop.eup %298 }
 0x12c   :  { %v184_v42 = vmul.f32 %v299_v40, %v182_v38 }
 0x12e   :  { %v186_v43 = vsel %vm185_vm7, %v182_v38, %v184_v42 }
 0x12f   :  { %v189_v48 = vsel %vm187_vm8, %v188_v45, %v186_v43 }
 0x130   :  { %v190_v54 = vmax.f32 %v189_v48, 1e-12 }
 0x1a0   :  { %v152_v39 = vpop.xlane.xlu0 %151 }
 0x1a1   :  { %300 = vrsqrt.f32 %v152_v39  ;;  %vm158_vm9 = vcmp.eq.f32.partialorder %v152_v39, inf  ;;  %v161_v47 = vand.u32 2147483648, %v152_v39  ;;  %vm160_vm10 = vcmp.eq.f32.partialorder %v152_v39, 0.0 }
 0x1a4   :  { %v155_v41 = vpop.xlane.xlu0 %154 }
 0x1a5   :  { %302 = vrsqrt.f32 %v155_v41  ;;  %vm165_vm11 = vcmp.eq.f32.partialorder %v155_v41, inf  ;;  %v168_v55 = vand.u32 2147483648, %v155_v41  ;;  %vm167_vm12 = vcmp.eq.f32.partialorder %v155_v41, 0.0 }
 0x1ab   :  { %v301_v44 = vpop.eup %300 }
 0x1ac   :  { %v157_v46 = vmul.f32 %v301_v44, %v152_v39 }
 0x1ae   :  { %v159_v49 = vsel %vm158_vm9, %v152_v39, %v157_v46 }
 0x1af   :  { %v303_v50 = vpop.eup %302  ;;  %v162_v51 = vsel %vm160_vm10, %v161_v47, %v159_v49 }
 0x1b0   :  { %v170_v52 = vmax.f32 %v162_v51, 1e-12  ;;  %v164_v53 = vmul.f32 %v303_v50, %v155_v41 }
 0x1b2   :  { %304 = vrcp.f32 %v170_v52  ;;  %v166_v56 = vsel %vm165_vm11, %v155_v41, %v164_v53 }
 0x1b3   :  { %v169_v57 = vsel %vm167_vm12, %v168_v55, %v166_v56  ;;  %306 = vrcp.f32 %v190_v54 }
 0x1b4   :  { %v171_v58 = vmax.f32 %v169_v57, 1e-12 }
 0x1b6   :  { %308 = vrcp.f32 %v171_v58 }
 0x1bc   :  { %v305_v59 = vpop.eup %304 }
 0x1bd   :  { %v193_v60 = vmul.f32 %v305_v59, %v139_v27  ;;  %v307_v61 = vpop.eup %306 }
 0x1bf   :  { %v195_v62 = vmul.f32 %v307_v61, %v193_v60 }
 0x1c0   :  { %v309_v63 = vpop.eup %308 }
 0x1c1   :  { %v194_v0 = vmul.f32 %v309_v63, %v140_v26  ;;  %v197_v1 = vsub.f32 0.0, %v195_v62  ;;  %v215_v2 = vmul.f32 -0.11111111, %v195_v62 }
 0x1c3   :  { %v196_v3 = vmul.f32 %v307_v61, %v194_v0  ;;  %v199_v5 = vsel %vm146_vm6, %v197_v1, %v195_v62  ;;  %v217_v7 = vsel %vm146_vm6, %v215_v2, %v195_v62 }
 0x1c4   :  { %v201_v10 = vsel %vm27_vm4, %v199_v5, -inf  ;;  %v219_v12 = vmul.f32 %v217_v7, %v217_v7 }
 0x1c5   :  { %v198_v4 = vsub.f32 0.0, %v196_v3  ;;  %v216_v6 = vmul.f32 -0.11111111, %v196_v3 }
 0x1c6   :  { %v221_v16 = vsel %vm27_vm4, %v219_v12, 0.0 }
 0x1c7   :  { %v200_v8 = vsel %vm147_vm5, %v198_v4, %v196_v3  ;;  %v218_v9 = vsel %vm147_vm5, %v216_v6, %v196_v3 }
 0x1c8   :  { %v202_v11 = vsel %vm29_vm0, %v200_v8, -inf  ;;  %v220_v13 = vmul.f32 %v218_v9, %v218_v9 }
 0x1c9   :  { %v203_v14 = vmax.f32 %v201_v10, %v202_v11 }
 0x1ca   :  { %v222_v15 = vsel %vm29_vm0, %v220_v13, 0.0  ;;  %vm242_vm0 = vcmp.eq.s32.totalorder %v400_v24, 0 }
 0x1cb   :  { %204 = vmax.xlane.f32.xlu1 %v203_v14  ;;  %v223_v17 = vadd.f32 %v222_v15, %v221_v16 }
 0x1cf   :  { %224 = vadd.xlane.f32.xlu1 %v223_v17 }
 0x258   :  { %v205_v18 = vpop.xlane.xlu1 %204 }
 0x259   :  { %v206_v19 = vrot.slane %v205_v18, 4 }
 0x25b   :  { %v207_v20 = vmax.f32 %v205_v18, %v206_v19 }
 0x25c   :  { %v225_v21 = vpop.xlane.xlu1 %224 }
 0x25d   :  { %v208_v22 = vrot.slane %v207_v20, 2  ;;  %v226_v23 = vrot.slane %v225_v21, 4 }
 0x25f   :  { %v227_v25 = vadd.f32 %v226_v23, %v225_v21  ;;  %v209_v26 = vmax.f32 %v207_v20, %v208_v22 }
 0x261   :  { %v228_v27 = vrot.slane %v227_v25, 2  ;;  %v210_v28 = vrot.slane %v209_v26, 1 }
 0x263   :  { %v229_v29 = vadd.f32 %v228_v27, %v227_v25  ;;  %v211_v30 = vmax.f32 %v209_v26, %v210_v28 }
 0x265   :  { %285 = vpush %v211_v30  ;;  %v230_v31 = vrot.slane %v229_v29, 1 }
 0x267   :  { %v231_v32 = vadd.f32 %v230_v31, %v229_v29 }
 0x269   :  { %287 = vpush %v231_v32 }
 0x296   :  { %s286_s0 = spop %285 }
 0x297   :  { %s213_s22 = smax.f32 %s364_s21, %s286_s0 }
 0x298   :  { %s214_s24 = smin.f32 %s365_s23, %s213_s22 }
 0x299   :  { %v244_v39 = vstv %s214_s24 }
 0x29a   :  { %s288_s20 = spop %287  ;;  %v245_v40 = vsel %vm243_vm15, %v244_v39, 0.0 }
 0x29b   :  { %v233_v33 = vstv %s288_s20 }
 0x29c   :  { %310 = vrsqrt.f32 %v233_v33  ;;  %vm236_vm13 = vcmp.eq.f32.partialorder %v233_v33, inf  ;;  %v239_v36 = vand.u32 2147483648, %v233_v33  ;;  %vm238_vm14 = vcmp.eq.f32.partialorder %v233_v33, 0.0 }
 0x2a6   :  { %v311_v34 = vpop.eup %310 }
 0x2a7   :  { %v235_v35 = vmul.f32 %v311_v34, %v233_v33 }
 0x2a9   :  { %v237_v37 = vsel %vm236_vm13, %v233_v33, %v235_v35 }
 0x2aa   :  { %v240_v38 = vsel %vm238_vm14, %v239_v36, %v237_v37 }
 0x2ab   :  { %289 = vpush %v240_v38 }
 0x2dc   :  { %s290_s27 = spop %289 }
 0x2dd   :  { %v246_v41 = vstv %s290_s27 }
 0x2de   :  { %v247_v42 = vsel %vm242_vm0, %v246_v41, %v245_v40 }
 0x2df   :  { %248 = vst [vmem:[#allocation6] sm:$0x1] %v247_v42 }
 0x2e0   :  { %345 = shalt.err (!%p342_p12)
}
 0x2e1   :  { %s346_s3 = scalar_lea.hbm %s448_s1, 16 }
 0x2e2   :  { %p347_p13 = scmp.ne.s32.totalorder %s448_s1, %s346_s3  ;;  %p350_p0 = scmp.lt.u32.totalorder %s346_s3, %s448_s1 }
 0x2e4   :  { %p352_p1 = pnand %p350_p0, %p347_p13 }
 0x2e6   :  { %355 = shalt.err (!%p352_p1)
}
 0x2e7   :  { %258 = dma.vmem_to_hbm [thread:$0]  %s256_s26, 16, %s448_s1, [#allocation5]  }
 0x2e8   :  { %358 = dma.done.wait [#allocation5], 16  }
 0x2e9   :  { %359 = vsyncadd [#allocation5], 4294967280 }
 0x2ea   :  { %262 = vsyncpa [#allocation4], 1 }
 0x2eb   :  { %263 = vsyncpa [#allocation5], 1 }

</bundles_post_ra>
